<compile_context>
chip_gen: v6e
topology: v6e:2x2x1
jax: 0.10.0
libtpu: 0.0.40
codegen_flags: <defaults>
</compile_context>

<pallas_src>
import jax
import jax.numpy as jnp
from jax import lax
from jax.experimental import pallas as pl
from jax.experimental.pallas import tpu as pltpu


def _pa_matmul_kernel(x_ref, w_ref, o_ref):
    # x_ref: (tile_n, F)   row tile of the flattened input
    # w_ref: (tile_f, F)   rows of the weight (out_features x in_features)
    # o_ref: (tile_n, tile_f)
    # y[n, o] = sum_i x[n, i] * W[o, i]  ==  x @ W.T, contracted natively on
    # the MXU by contracting the last dim of both operands (no transpose).
    o_ref[...] = lax.dot_general(
        x_ref[...],
        w_ref[...],
        dimension_numbers=(((1,), (1,)), ((), ())),
        preferred_element_type=jnp.float32,
    ).astype(o_ref.dtype)


def _round_up(x, m):
    return ((x + m - 1) // m) * m


def pa_forward(x, weight):
    """Pallas equivalent of pa.forward.

    x:      (N, F) or (N, C, H, W) float array
    weight: (F, F) float array (PyTorch conv "weight", out x in)
    returns (N, F)
    """
    if x.ndim != 2:
        x = x.reshape(x.shape[0], -1)          # flatten(1) -- glue
    n, f = x.shape
    assert weight.shape == (f, f), "weight must be (feat_dim, feat_dim)"

    # PyTorch's F.conv2d requires matching dtypes; align once in the wrapper
    # (keeps bf16 inputs on the fast bf16 MXU path, f32 accumulation in-kernel).
    if weight.dtype != x.dtype:
        weight = weight.astype(x.dtype)

    itemsize = jnp.dtype(x.dtype).itemsize
    # Sublane multiple: 8 (f32), 16 (bf16), 32 (int8/fp8) -- sub-32-bit dtypes
    # pack along sublanes, so the row-tile must be a multiple of this.
    sub = max(8, 32 // itemsize)

    # Row tile: as large as reasonable (few grid steps, full MXU occupancy),
    # capped at 512.  No padding of N: Pallas masks the partial block.
    tile_n = min(512, _round_up(n, sub))
    # Output-feature tile: full F when small, else a 128-multiple slab so the
    # output stays lane-dense and the per-step weight block stays bounded.
    tile_f = f if f <= 512 else 512

    # Keep the double-buffered working set under the default scoped-VMEM limit
    # (and well under v7x's 64 MiB physical VMEM).
    budget = 24 * 1024 * 1024

    def footprint(tn, tf):
        # 2x for double-buffering of each of x-tile, w-slab, out-tile.
        return 2 * itemsize * (tn * f + tf * f + tn * tf)

    while footprint(tile_n, tile_f) > budget:
        if tile_f > 128 and tile_f % 128 == 0:
            tile_f = max(128, _round_up(tile_f // 2, 128))
        elif tile_n > sub:
            tile_n = max(sub, _round_up(tile_n // 2, sub))
        else:
            break
    # TODO(synk): for very large feat_dim (>= ~8K) also tile the contraction
    # dim with an f32 VMEM accumulator + pl.when init/finalize.

    grid = (pl.cdiv(n, tile_n), pl.cdiv(f, tile_f))

    out = pl.pallas_call(
        _pa_matmul_kernel,
        out_shape=jax.ShapeDtypeStruct((n, f), x.dtype),
        grid_spec=pltpu.PrefetchScalarGridSpec(
            num_scalar_prefetch=0,
            grid=grid,
            in_specs=[
                pl.BlockSpec((tile_n, f), lambda i, j: (i, 0)),   # x row tile
                pl.BlockSpec((tile_f, f), lambda i, j: (j, 0)),   # W row slab
            ],
            out_specs=pl.BlockSpec((tile_n, tile_f), lambda i, j: (i, j)),
        ),
        compiler_params=pltpu.CompilerParams(
            dimension_semantics=("parallel", "parallel"),
        ),
        cost_estimate=pl.CostEstimate(
            flops=2 * n * f * f,
            transcendentals=0,
            bytes_accessed=itemsize * (2 * n * f + f * f),
        ),
    )(x, weight)

    return out


if __name__ == "__main__":
    key = jax.random.PRNGKey(0)
    k1, k2, k3, k4 = jax.random.split(key, 4)

    feat_dim = 32
    # Deterministic parameter init, exactly as in pa.__init__: ones(F, F).
    weight = jnp.ones((feat_dim, feat_dim), dtype=jnp.float32)

    # Case 1: 4D input (N, C, H, W) with C*H*W == feat_dim -> flattened inside.
    x4d = jax.random.normal(k1, (2, 4, 4, 2), dtype=jnp.float32)
    # Case 2: 2D input (N, feat_dim).
    x2d = jax.random.normal(k2, (8, feat_dim), dtype=jnp.float32)

    y4d = jax.block_until_ready(pa_forward(x4d, weight))
    y2d = jax.block_until_ready(pa_forward(x2d, weight))

    ref4d = x4d.reshape(x4d.shape[0], -1) @ weight.T
    ref2d = x2d @ weight.T
    assert y4d.shape == (2, feat_dim)
    assert y2d.shape == (8, feat_dim)
    assert jnp.allclose(y4d, ref4d, atol=1e-5, rtol=1e-5)
    assert jnp.allclose(y2d, ref2d, atol=1e-5, rtol=1e-5)

    # Case 3: larger lane-dense case exercising a multi-block grid and a
    # partial trailing row block (no jnp.pad on the input).
    f_big = 256
    w_big = jax.random.normal(k3, (f_big, f_big), dtype=jnp.float32) * 0.05
    x_big = jax.random.normal(k4, (600, f_big), dtype=jnp.float32)
    y_big = jax.block_until_ready(pa_forward(x_big, w_big))
    ref_big = x_big @ w_big.T
    assert y_big.shape == (600, f_big)
    assert jnp.allclose(y_big, ref_big, atol=1e-2, rtol=1e-2)

    print("KERNEL_OK")
</pallas_src>

<mosaic_0001>
module attributes {stable_mosaic.version = 11 : i64} {
  func.func @_pa_matmul_kernel(%arg0: i32, %arg1: i32, %arg2: memref<8x32xf32, #tpu.memory_space<vmem>>, %arg3: memref<32x32xf32, #tpu.memory_space<vmem>>, %arg4: memref<8x32xf32, #tpu.memory_space<vmem>>) attributes {dimension_semantics = [#tpu.dimension_semantics<parallel>, #tpu.dimension_semantics<parallel>], iteration_bounds = array<i64: 1, 1>, scalar_prefetch = 0 : i64, scratch_operands = 0 : i64, tpu.core_type = #tpu.core_type<tc>, window_params = [{transform_indices = @transform_0, window_bounds = array<i64: 8, 32>}, {transform_indices = @transform_1, window_bounds = array<i64: 32, 32>}, {transform_indices = @transform_2, window_bounds = array<i64: 8, 32>}]} {
    %c0 = arith.constant 0 : index
    %c0_0 = arith.constant 0 : index
    %0 = vector.load %arg2[%c0, %c0_0] : memref<8x32xf32, #tpu.memory_space<vmem>>, vector<8x32xf32>
    %c0_1 = arith.constant 0 : index
    %c0_2 = arith.constant 0 : index
    %1 = vector.load %arg3[%c0_1, %c0_2] : memref<32x32xf32, #tpu.memory_space<vmem>>, vector<32x32xf32>
    %cst = arith.constant dense<0.000000e+00> : vector<8x32xf32>
    %2 = tpu.matmul %0, %1, %cst {dimension_numbers = #tpu.dot_dimension_numbers<[1], [1], [0], [0], [0, 0, 1, 0], [], []>} : vector<8x32xf32>, vector<32x32xf32>, vector<8x32xf32> -> vector<8x32xf32>
    %c0_3 = arith.constant 0 : index
    %c0_4 = arith.constant 0 : index
    %3 = vector.load %arg4[%c0_3, %c0_4] : memref<8x32xf32, #tpu.memory_space<vmem>>, vector<8x32xf32>
    tpu.vector_store %arg4[%c0_3, %c0_4], %2 {strides = array<i32>} : memref<8x32xf32, #tpu.memory_space<vmem>>, vector<8x32xf32>,
    return
  }
  func.func @transform_0(%arg0: i32, %arg1: i32) -> (i32, i32) {
    %c0_i32 = arith.constant 0 : i32
    %c0_i32_0 = arith.constant 0 : i32
    return %arg0, %c0_i32 : i32, i32
  }
  func.func @transform_1(%arg0: i32, %arg1: i32) -> (i32, i32) {
    %c0_i32 = arith.constant 0 : i32
    %c0_i32_0 = arith.constant 0 : i32
    return %arg1, %c0_i32 : i32, i32
  }
  func.func @transform_2(%arg0: i32, %arg1: i32) -> (i32, i32) {
    %c0_i32 = arith.constant 0 : i32
    return %arg0, %arg1 : i32, i32
  }
}

</mosaic_0001>

<bundles_post_ra>
// kernel: tpu_custom_call.1
= control target key start
LH: loop header
LB: loop body
LE: loop exit
PB: predicated region body
PF: predicated region fallthrough
CT: control target
= control target key end

     0   :  { %7 = vsyncpa [#allocation3], 0  ;;  %s285_s0 = inlined_call_operand.hbm [shape: f32[2,32], index: 0, kind: input, shape index: {}]   ;;  %s286_s1 = inlined_call_operand.hbm [shape: f32[32,32], index: 1, kind: input, shape index: {}]   ;;  %s287_s2 = inlined_call_operand.hbm [shape: f32[2,32], index: 2, kind: output, shape index: {}]  }
   0x1   :  { %8 = vsyncpa [#allocation6], 0 }
   0x2   :  { %9 = vsyncpa [#allocation4], 0 }
   0x3   :  { %14 = vsyncadd [#allocation3], 96  ;;  %s246_s9 = smov [#allocation2]  }
   0x4   :  { %s15_s10 = sshll.u32 %s246_s9, 4  ;;  %s16_s10 = int_to_ptr.vmem [resolvable:$true] %s15_s10 }
   0x5   :  { %s188_s11 = scalar_lea.vmem %s16_s10, 32  ;;  %s192_s12 = scalar_lea.vmem %s16_s10, 128 }
   0x6   :  { %p189_p0 = scmp.ne.s32.totalorder %s16_s10, %s188_s11  ;;  %p193_p1 = scmp.lt.s32.totalorder %s16_s10, %s16_s10 }
   0x7   :  { %p194_p2 = scmp.lt.s32.totalorder %s192_s12, %s188_s11 }
   0x9   :  { %p195_p3 = por %p194_p2, %p193_p1 }
   0xb   :  { %p196_p4 = pnand %p195_p3, %p189_p0 }
   0xd   :  { %199 = shalt.err (!%p196_p4)
}
   0xe   :  { %s247_s13 = smov 32   ;;  %s248_s14 = smov 2  }
   0xf   :  { %21 = dma.hbm_to_vmem [thread:$0]  %s285_s0, 32, %s16_s10, [#allocation3], %s247_s13, %s247_s13, %s248_s14  }
  0x10   :  { %s249_s17 = smov [#allocation5]  }
  0x11   :  { %s27_s18 = sshll.u32 %s249_s17, 4  ;;  %s28_s18 = int_to_ptr.vmem [resolvable:$true] %s27_s18 }
  0x12   :  { %s208_s19 = scalar_lea.vmem %s28_s18, 512  ;;  %p213_p6 = scmp.lt.s32.totalorder %s28_s18, %s28_s18 }
  0x13   :  { %p209_p5 = scmp.ne.s32.totalorder %s28_s18, %s208_s19  ;;  %p214_p7 = scmp.lt.s32.totalorder %s208_s19, %s208_s19 }
  0x15   :  { %p215_p8 = por %p214_p7, %p213_p6 }
  0x17   :  { %p216_p9 = pnand %p215_p8, %p209_p5 }
  0x19   :  { %219 = shalt.err (!%p216_p9)
}
  0x1a   :  { %s250_s20 = smov 128   ;;  %s251_s21 = smov 8  }
  0x1b   :  { %33 = dma.hbm_to_vmem [thread:$0]  %s286_s1, 512, %s28_s18, [#allocation6], %s250_s20, %s250_s20, %s251_s21  }
  0x1c   :  { %240 = dma.done.wait [#allocation3], 128  }
  0x1d   :  { %241 = vsyncadd [#allocation3], 4294967168 }
  0x1e   :  { %242 = dma.done.wait [#allocation6], 512  }
  0x1f   :  { %243 = vsyncadd [#allocation6], 4294966784  ;;  %v252_v0 = vmov 0.0   ;;  %vm253_vm0 = vmmov 0   ;;  %vm45_vm1 = vcmask 261120   ;;  %v44_v1 = vld [vmem:[#allocation5 + $0x18] sm:$0xff] }
  0x20   :  { %160 = vmatprep.subr.mxu0 %v252_v0  ;;  %168 = vmatprep.mubr.msk.f32.mxu0 %vm253_vm0, %v252_v0  ;;  %v43_v2 = vld [vmem:[#allocation5 + $0x10] sm:$0xff]  ;;  %v42_v3 = vld [vmem:[#allocation5 + $0x8] sm:$0xff]  ;;  %v41_v4 = vld [vmem:[#allocation5] sm:$0xff] }
  0x21   :  { %161 = vmatpush3.xpose.msk.msra.mxu0 %vm45_vm1, %v44_v1  ;;  %v40_v5 = vld [vmem:[#allocation2] sm:$0xff] }
  0x22   :  { %162 = vmatprep.subr.mxu0 %v252_v0 }
  0x25   :  { %163 = vmatpush3.xpose.msk.msra.mxu0 %vm45_vm1, %v43_v2 }
  0x26   :  { %164 = vmatprep.subr.mxu0 %v252_v0 }
  0x29   :  { %165 = vmatpush3.xpose.msk.msra.mxu0 %vm45_vm1, %v42_v3 }
  0x2a   :  { %166 = vmatprep.subr.mxu0 %v252_v0 }
  0x2d   :  { %167 = vmatpush3.xpose.msk.msra.mxu0 %vm45_vm1, %v41_v4 }
  0x30   :  { %169 = vmatmul.mubr.msk.f32.vlgmr.msra.gmra.mxu0 %vm45_vm1, %v40_v5 }
  0xf0   :  { %v127_v6 = vpop.f32.mrf.mxu0 }
  0xf1   :  { %131 = vst.msk [vmem:[#allocation7] sm:$0xff] %vm45_vm1, %v127_v6 }
  0xf2   :  { %v170_v7 = vpop.f32.mrf.mxu0 }
  0xf3   :  { %136 = vsyncadd [#allocation4], 96  ;;  %s254_s0 = smov [#allocation7]  }
  0xf4   :  { %s137_s1 = sshll.u32 %s254_s0, 4  ;;  %s138_s1 = int_to_ptr.vmem [resolvable:$true] %s137_s1 }
  0xf5   :  { %s220_s24 = scalar_lea.vmem %s138_s1, 32  ;;  %s224_s25 = scalar_lea.vmem %s138_s1, 128 }
  0xf6   :  { %p221_p10 = scmp.ne.s32.totalorder %s138_s1, %s220_s24  ;;  %p225_p11 = scmp.lt.s32.totalorder %s138_s1, %s138_s1 }
  0xf7   :  { %p226_p12 = scmp.lt.s32.totalorder %s224_s25, %s220_s24 }
  0xf9   :  { %p227_p13 = por %p226_p12, %p225_p11 }
  0xfb   :  { %p228_p0 = pnand %p227_p13, %p221_p10 }
  0xfd   :  { %231 = shalt.err (!%p228_p0)
}
  0xfe   :  { %143 = dma.vmem_to_hbm [thread:$0]  %s138_s1, 32, %s287_s2, [#allocation4], %s247_s13, %s247_s13, %s248_s14  }
  0xff   :  { %244 = dma.done.wait [#allocation4], 128  }
 0x100   :  { %245 = vsyncadd [#allocation4], 4294967168 }
 0x101   :  { %147 = vsyncpa [#allocation3], 1 }
 0x102   :  { %148 = vsyncpa [#allocation6], 1 }
 0x103   :  { %149 = vsyncpa [#allocation4], 1 }

</bundles_post_ra>
